<compile_context>
chip_gen: v5e
topology: v5e:2x2
jax: 0.10.0
libtpu: 0.0.40
codegen_flags: <defaults>
</compile_context>

<pallas_src>
import jax
import jax.numpy as jnp
from jax import lax
from jax.experimental import pallas as pl
from jax.experimental.pallas import tpu as pltpu


# ----------------------------- Pallas kernel --------------------------------

def _make_bmm_kernel(trans_b):
    # a_ref: (tb, tm, tk); b_ref: (tb, tk, tn) or (tb, tn, tk) when trans_b;
    # o_ref: (tb, tm, tn); acc_ref: (tb, tm, tn) float32.
    cb = 2 if trans_b else 1
    dnums = (((2,), (cb,)), ((0,), (0,)))

    def kernel(a_ref, b_ref, o_ref, acc_ref):
        k = pl.program_id(3)
        prod = lax.dot_general(a_ref[...], b_ref[...], dnums,
                               preferred_element_type=jnp.float32)

        @pl.when(k == 0)
        def _():
            acc_ref[...] = prod          # first partial product: skip zero-fill

        @pl.when(k > 0)
        def _():
            acc_ref[...] += prod

        @pl.when(k == pl.num_programs(3) - 1)
        def _():
            # Downcast only once, after the full K reduction.
            o_ref[...] = acc_ref[...].astype(o_ref.dtype)

    return kernel


def _round_up(x, m):
    return (x + m - 1) // m * m


def _pick_tile(dim, candidates, align):
    """Padding-aware tile choice: whole (rounded) dim if it fits the largest
    candidate, else the largest candidate with <=12.5% padding overshoot, else
    the candidate minimizing padded size."""
    cands = sorted({_round_up(c, align) for c in candidates}, reverse=True)
    if dim <= cands[0]:
        return _round_up(dim, align)
    best = None
    for t in cands:
        padded = _round_up(dim, t)
        if (padded - dim) / dim <= 0.125:
            return t
        if best is None or padded < best[0]:
            best = (padded, t)
    return best[1]


def _pallas_bmm(a3, b3, trans_b, out_dtype):
    """Batched matmul: a3 (B, M, K) @ b3 (B, K, N) [or (B, N, K) when trans_b]."""
    B, M, K = a3.shape
    N = b3.shape[1] if trans_b else b3.shape[2]

    # bf16 packs 2 rows/sublane -> align sublane-dims to 16 for 2-byte dtypes.
    pack = 16 if min(a3.dtype.itemsize, b3.dtype.itemsize) == 2 else 8
    tm = _pick_tile(M, (512, 256, 128), pack)
    tn = _pick_tile(N, (512, 256, 128), 128)        # lane-dense output stores
    tk = _pick_tile(K, (1024, 512, 256), 128 if K >= 128 else pack)

    Mp, Np, Kp = _round_up(M, tm), _round_up(N, tn), _round_up(K, tk)

    # Fold several batch elements into one grid step for many-small-matmul
    # einsums (amortizes ~0.35us/step overhead and padded-lane DMA waste).
    tb = 1
    if Mp <= 128 and Np <= 128 and B > 1:
        tb = max(1, min(B, 512 // max(Mp, Np)))
        while B % tb:
            tb -= 1

    # TODO(synk): remainder tiles are still zero-padded in HBM; masking the
    # final partial K/M/N tile in-kernel would remove this extra HBM pass.
    a_shape = (B, Mp, Kp)
    b_shape = (B, Np, Kp) if trans_b else (B, Kp, Np)
    if a3.shape != a_shape:
        a3 = jnp.pad(a3, [(0, t - s) for s, t in zip(a3.shape, a_shape)])
    if b3.shape != b_shape:
        b3 = jnp.pad(b3, [(0, t - s) for s, t in zip(b3.shape, b_shape)])

    grid = (B // tb, Mp // tm, Np // tn, Kp // tk)

    a_spec = pl.BlockSpec((tb, tm, tk), lambda bb, i, j, k: (bb, i, k))
    if trans_b:
        b_spec = pl.BlockSpec((tb, tn, tk), lambda bb, i, j, k: (bb, j, k))
    else:
        b_spec = pl.BlockSpec((tb, tk, tn), lambda bb, i, j, k: (bb, k, j))
    o_spec = pl.BlockSpec((tb, tm, tn), lambda bb, i, j, k: (bb, i, j))

    out_isize = jnp.dtype(out_dtype).itemsize
    flops = 2 * B * Mp * Np * Kp
    # Include input re-streaming: A is read Np/tn times, B is read Mp/tm times.
    bytes_accessed = (int(a3.size) * a3.dtype.itemsize * (Np // tn)
                      + int(b3.size) * b3.dtype.itemsize * (Mp // tm)
                      + B * Mp * Np * out_isize)
    # Double-buffered live VMEM + accumulator; raise the scoped limit when the
    # tiles need it (v5e defaults to 16 MiB) but stay <=48 MiB for v7x (64 MiB).
    live = (2 * tb * tm * tk * a3.dtype.itemsize
            + 2 * tb * tk * tn * b3.dtype.itemsize
            + 2 * tb * tm * tn * out_isize
            + tb * tm * tn * 4)
    vmem_limit = int(min(max(2 * live, 32 << 20), 48 << 20))

    out = pl.pallas_call(
        _make_bmm_kernel(trans_b),
        out_shape=jax.ShapeDtypeStruct((B, Mp, Np), out_dtype),
        grid_spec=pltpu.PrefetchScalarGridSpec(
            num_scalar_prefetch=0,
            grid=grid,
            in_specs=[a_spec, b_spec],
            out_specs=o_spec,
            scratch_shapes=[pltpu.VMEM((tb, tm, tn), jnp.float32)],
        ),
        compiler_params=pltpu.CompilerParams(
            dimension_semantics=("parallel", "parallel", "parallel", "arbitrary"),
            vmem_limit_bytes=vmem_limit),
        cost_estimate=pl.CostEstimate(
            flops=flops, transcendentals=0, bytes_accessed=bytes_accessed),
    )(a3, b3)

    if (Mp, Np) != (M, N):
        out = out[:, :M, :N]
    return out


# --------------------------- einsum decomposition ----------------------------

def _parse_equation(equation, num_inputs):
    eq = equation.replace(" ", "")
    if "..." in eq:
        # TODO(synk): ellipsis ('...') broadcasting not supported in this kernel.
        raise NotImplementedError("ellipsis not supported")
    if "->" in eq:
        lhs, out = eq.split("->")
    else:
        lhs, out = eq, None
    in_specs = lhs.split(",")
    assert len(in_specs) == num_inputs, "equation/operand count mismatch"
    if out is None:
        counts = {}
        for spec in in_specs:
            for c in spec:
                counts[c] = counts.get(c, 0) + 1
        out = "".join(sorted(c for c, n in counts.items() if n == 1))
    return in_specs, out


def _sum_unused(x, labels, keep):
    """Sum out labels not in `keep`; return (array, remaining labels)."""
    axes = tuple(i for i, c in enumerate(labels) if c not in keep)
    if axes:
        x = jnp.sum(x, axis=axes)
        labels = "".join(c for c in labels if c in keep)
    return x, labels


def _diag_repeated(x, labels):
    """Handle repeated labels within a single operand (take diagonal)."""
    while len(set(labels)) != len(labels):
        for c in labels:
            if labels.count(c) > 1:
                i = labels.index(c)
                j = labels.index(c, i + 1)
                x = jnp.diagonal(x, axis1=i, axis2=j)
                labels = "".join(
                    labels[k] for k in range(len(labels)) if k not in (i, j)) + c
                break
    return x, labels


def _detect_trans(labels, batch, free, contract, is_lhs):
    """None: needs a materialized transpose; False: native layout; True: the
    kernel's fused-trans_b layout (rhs only)."""
    lab = list(labels)
    if is_lhs:
        if lab == batch + free + contract:      # (B, M, K)
            return False
        # TODO(synk): a fused trans_a (lhs (B, K, M)) variant would also avoid
        # this transpose; kept on the wrapper path for lowering robustness.
        return None
    if lab == batch + contract + free:          # (B, K, N)
        return False
    if lab == batch + free + contract:          # (B, N, K) -> fused transpose
        return True
    return None


def _prep(x, labels, batch, free, contract, is_lhs):
    """Reshape an operand to 3D, using the fused-trans_b kernel layout when it
    avoids a materialized HBM transpose.  Returns (x3, trans_b_flag)."""
    sizes = dict(zip(labels, x.shape))
    trans = _detect_trans(labels, batch, free, contract, is_lhs)
    if trans is None:
        order = batch + free + contract if is_lhs else batch + contract + free
        perm = [list(labels).index(c) for c in order]
        x = jnp.transpose(x, perm)
        trans = False

    def prod_of(group):
        r = 1
        for c in group:
            r *= sizes[c]
        return r

    pb, pf, pc = prod_of(batch), prod_of(free), prod_of(contract)
    if is_lhs:
        shape3 = (pb, pf, pc)                       # (B, M, K)
    else:
        shape3 = (pb, pf, pc) if trans else (pb, pc, pf)   # (B,N,K) / (B,K,N)
    return x.reshape(shape3), bool(trans)


class EinSum:
    """JAX/Pallas re-implementation of the torch EinSum module (1 or 2 operands)."""

    def __init__(self, equation, use_bf16=False):
        self.equation = equation
        # Optional: cast float inputs to bf16 before the MXU (f32 accumulation
        # kept in VMEM); halves HBM traffic at reduced precision.  Off by
        # default to preserve torch.einsum f32 semantics.
        self.use_bf16 = use_bf16

    def __call__(self, *inputs):
        in_specs, out = _parse_equation(self.equation, len(inputs))
        out_dtype = jnp.result_type(*[x.dtype for x in inputs])

        if not jnp.issubdtype(out_dtype, jnp.floating):
            # TODO(synk): integer/bool einsum kept on XLA (torch does exact
            # integer accumulation; v7x MXU has no integer path).
            return jnp.einsum(self.equation, *inputs)

        if len(inputs) == 1:
            x, la = _diag_repeated(inputs[0], in_specs[0])
            x, la = _sum_unused(x, la, set(out))
            perm = [la.index(c) for c in out]
            if perm != list(range(len(perm))):
                x = jnp.transpose(x, perm)
            return x.astype(out_dtype)

        if len(inputs) != 2:
            # TODO(synk): >2-operand einsum not supported; torch folds pairwise anyway.
            raise NotImplementedError(">2 operands not supported")

        a, b = inputs
        la, lb = in_specs
        a, la = _diag_repeated(a, la)
        b, lb = _diag_repeated(b, lb)

        set_a, set_b, set_o = set(la), set(lb), set(out)
        a, la = _sum_unused(a, la, set_b | set_o)
        b, lb = _sum_unused(b, lb, set_a | set_o)
        set_a, set_b = set(la), set(lb)

        batch = [c for c in la if c in set_b and c in set_o]
        contract = [c for c in la if c in set_b and c not in set_o]
        a_free = [c for c in la if c not in set_b]          # all in output
        b_free = [c for c in lb if c not in set_a]

        dims = {}
        for lbl, arr in ((la, a), (lb, b)):
            for c, d in zip(lbl, arr.shape):
                if c in dims:
                    assert dims[c] == d, f"size mismatch for einsum label '{c}'"
                dims[c] = d

        # Swap operands (compute N x M) when that removes HBM passes (avoids a
        # materialized output transpose without adding operand transposes).
        natural = "".join(batch + a_free + b_free)
        swapped = "".join(batch + b_free + a_free)

        def _n_transposes(lhs_lab, lhs_free, rhs_lab, rhs_free, out_order):
            c = 0
            c += _detect_trans(lhs_lab, batch, lhs_free, contract, True) is None
            c += _detect_trans(rhs_lab, batch, rhs_free, contract, False) is None
            c += out_order != out
            return c

        do_swap = (swapped == out and natural != out and
                   _n_transposes(lb, b_free, la, a_free, swapped)
                   < _n_transposes(la, a_free, lb, b_free, natural))
        if do_swap:
            lhs_x, lhs_lab, lhs_free = b, lb, b_free
            rhs_x, rhs_lab, rhs_free = a, la, a_free
        else:
            lhs_x, lhs_lab, lhs_free = a, la, a_free
            rhs_x, rhs_lab, rhs_free = b, lb, b_free

        lhs3, _ = _prep(lhs_x, lhs_lab, batch, lhs_free, contract, is_lhs=True)
        rhs3, trans_b = _prep(rhs_x, rhs_lab, batch, rhs_free, contract, is_lhs=False)

        if self.use_bf16:
            lhs3 = lhs3.astype(jnp.bfloat16)
            rhs3 = rhs3.astype(jnp.bfloat16)

        K = 1
        for c in contract:
            K *= dims[c]

        if K < 8:
            # TODO(synk): tiny/empty contraction (outer-product-like) stays on
            # the XLA VPU path — MXU utilization would be <5% for K this small.
            cb = 2 if trans_b else 1
            o3 = lax.dot_general(lhs3, rhs3, (((2,), (cb,)), ((0,), (0,))),
                                 preferred_element_type=jnp.float32)
        else:
            o3 = _pallas_bmm(lhs3, rhs3, trans_b, out_dtype)   # (B, M, N)

        out_natural = batch + lhs_free + rhs_free
        o = o3.reshape([dims[c] for c in out_natural])
        perm = [out_natural.index(c) for c in out]
        if perm != list(range(len(perm))):
            o = jnp.transpose(o, perm)
        return o.astype(out_dtype)


# --------------------------------- demo --------------------------------------

if __name__ == "__main__":
    key = jax.random.PRNGKey(0)
    k1, k2, k3, k4, k5, k6 = jax.random.split(key, 6)

    # 1) batched matmul "bij,bjk->bik" (standard layout, batch folding tb>1)
    eq1 = "bij,bjk->bik"
    x1 = jax.random.normal(k1, (2, 8, 32), dtype=jnp.float32)
    y1 = jax.random.normal(k2, (2, 32, 16), dtype=jnp.float32)
    out1 = jax.block_until_ready(EinSum(eq1)(x1, y1))
    ref1 = jnp.einsum(eq1, x1, y1)
    assert out1.shape == ref1.shape, (out1.shape, ref1.shape)
    assert jnp.allclose(out1, ref1, atol=1e-4, rtol=1e-4), "mismatch (eq1)"

    # 2) attention-score style "bhqd,bhkd->bhqk" (fused trans_b, no transposes)
    eq2 = "bhqd,bhkd->bhqk"
    x2 = jax.random.normal(k3, (2, 2, 8, 16), dtype=jnp.float32)
    y2 = jax.random.normal(k4, (2, 2, 8, 16), dtype=jnp.float32)
    out2 = jax.block_until_ready(EinSum(eq2)(x2, y2))
    ref2 = jnp.einsum(eq2, x2, y2)
    assert out2.shape == ref2.shape, (out2.shape, ref2.shape)
    assert jnp.allclose(out2, ref2, atol=1e-4, rtol=1e-4), "mismatch (eq2)"

    # 3) plain matmul "ij,jk->ik" (no batch dim, B=1 path)
    eq3 = "ij,jk->ik"
    x3 = jax.random.normal(k5, (16, 32), dtype=jnp.float32)
    y3 = jax.random.normal(k6, (32, 24), dtype=jnp.float32)
    out3 = jax.block_until_ready(EinSum(eq3)(x3, y3))
    ref3 = jnp.einsum(eq3, x3, y3)
    assert out3.shape == ref3.shape, (out3.shape, ref3.shape)
    assert jnp.allclose(out3, ref3, atol=1e-4, rtol=1e-4), "mismatch (eq3)"

    # 4) output swaps M/N groups "bij,bkj->bki" (operand-swap path, trans_b)
    eq4 = "bij,bkj->bki"
    out4 = jax.block_until_ready(EinSum(eq4)(x1, jax.random.normal(k4, (2, 16, 32),
                                                                   dtype=jnp.float32)))
    ref4 = jnp.einsum(eq4, x1, jax.random.normal(k4, (2, 16, 32), dtype=jnp.float32))
    assert out4.shape == ref4.shape, (out4.shape, ref4.shape)
    assert jnp.allclose(out4, ref4, atol=1e-4, rtol=1e-4), "mismatch (eq4)"

    print("KERNEL_OK")
</pallas_src>

<mosaic_0001>
module attributes {stable_mosaic.version = 11 : i64} {
  func.func @kernel(%arg0: i32, %arg1: i32, %arg2: i32, %arg3: i32, %arg4: memref<2x8x32xf32, #tpu.memory_space<vmem>>, %arg5: memref<2x32x128xf32, #tpu.memory_space<vmem>>, %arg6: memref<2x8x128xf32, #tpu.memory_space<vmem>>, %arg7: memref<2x8x128xf32, #tpu.memory_space<vmem>>) attributes {dimension_semantics = [#tpu.dimension_semantics<parallel>, #tpu.dimension_semantics<parallel>, #tpu.dimension_semantics<parallel>, #tpu.dimension_semantics<arbitrary>], iteration_bounds = array<i64: 1, 1, 1, 1>, scalar_prefetch = 0 : i64, scratch_operands = 1 : i64, tpu.core_type = #tpu.core_type<tc>, window_params = [{transform_indices = @transform_0, window_bounds = array<i64: 2, 8, 32>}, {transform_indices = @transform_1, window_bounds = array<i64: 2, 32, 128>}, {transform_indices = @transform_2, window_bounds = array<i64: 2, 8, 128>}]} {
    %c0 = arith.constant 0 : index
    %c0_0 = arith.constant 0 : index
    %c0_1 = arith.constant 0 : index
    %0 = vector.load %arg4[%c0, %c0_0, %c0_1] : memref<2x8x32xf32, #tpu.memory_space<vmem>>, vector<2x8x32xf32>
    %c0_2 = arith.constant 0 : index
    %c0_3 = arith.constant 0 : index
    %c0_4 = arith.constant 0 : index
    %1 = vector.load %arg5[%c0_2, %c0_3, %c0_4] : memref<2x32x128xf32, #tpu.memory_space<vmem>>, vector<2x32x128xf32>
    %cst = arith.constant dense<0.000000e+00> : vector<2x8x128xf32>
    %2 = tpu.matmul %0, %1, %cst {dimension_numbers = #tpu.dot_dimension_numbers<[2], [1], [1], [2], [0, 0, 0, 1, 1, 2], [0], [0]>} : vector<2x8x32xf32>, vector<2x32x128xf32>, vector<2x8x128xf32> -> vector<2x8x128xf32>
    %c0_i32 = arith.constant 0 : i32
    %3 = arith.cmpi eq, %arg3, %c0_i32 : i32
    %4 = arith.extui %3 : i1 to i32
    %c0_i32_5 = arith.constant 0 : i32
    %5 = arith.cmpi ne, %4, %c0_i32_5 : i32
    scf.if %5 {
      %c0_10 = arith.constant 0 : index
      %c0_11 = arith.constant 0 : index
      %c0_12 = arith.constant 0 : index
      %12 = vector.load %arg7[%c0_10, %c0_11, %c0_12] : memref<2x8x128xf32, #tpu.memory_space<vmem>>, vector<2x8x128xf32>
      tpu.vector_store %arg7[%c0_10, %c0_11, %c0_12], %2 {strides = array<i32>} : memref<2x8x128xf32, #tpu.memory_space<vmem>>, vector<2x8x128xf32>,
    } else {
    }
    %c0_i32_6 = arith.constant 0 : i32
    %6 = arith.cmpi sgt, %arg3, %c0_i32_6 : i32
    %7 = arith.extui %6 : i1 to i32
    %c0_i32_7 = arith.constant 0 : i32
    %8 = arith.cmpi ne, %7, %c0_i32_7 : i32
    scf.if %8 {
      %c0_10 = arith.constant 0 : index
      %c0_11 = arith.constant 0 : index
      %c0_12 = arith.constant 0 : index
      %12 = vector.load %arg7[%c0_10, %c0_11, %c0_12] : memref<2x8x128xf32, #tpu.memory_space<vmem>>, vector<2x8x128xf32>
      %13 = arith.addf %12, %2 : vector<2x8x128xf32>
      %c0_13 = arith.constant 0 : index
      %c0_14 = arith.constant 0 : index
      %c0_15 = arith.constant 0 : index
      %14 = vector.load %arg7[%c0_13, %c0_14, %c0_15] : memref<2x8x128xf32, #tpu.memory_space<vmem>>, vector<2x8x128xf32>
      tpu.vector_store %arg7[%c0_13, %c0_14, %c0_15], %13 {strides = array<i32>} : memref<2x8x128xf32, #tpu.memory_space<vmem>>, vector<2x8x128xf32>,
    } else {
    }
    %c0_i32_8 = arith.constant 0 : i32
    %9 = arith.cmpi eq, %arg3, %c0_i32_8 : i32
    %10 = arith.extui %9 : i1 to i32
    %c0_i32_9 = arith.constant 0 : i32
    %11 = arith.cmpi ne, %10, %c0_i32_9 : i32
    scf.if %11 {
      %c0_10 = arith.constant 0 : index
      %c0_11 = arith.constant 0 : index
      %c0_12 = arith.constant 0 : index
      %12 = vector.load %arg7[%c0_10, %c0_11, %c0_12] : memref<2x8x128xf32, #tpu.memory_space<vmem>>, vector<2x8x128xf32>
      %c0_13 = arith.constant 0 : index
      %c0_14 = arith.constant 0 : index
      %c0_15 = arith.constant 0 : index
      %13 = vector.load %arg6[%c0_13, %c0_14, %c0_15] : memref<2x8x128xf32, #tpu.memory_space<vmem>>, vector<2x8x128xf32>
      tpu.vector_store %arg6[%c0_13, %c0_14, %c0_15], %12 {strides = array<i32>} : memref<2x8x128xf32, #tpu.memory_space<vmem>>, vector<2x8x128xf32>,
    } else {
    }
    return
  }
  func.func @transform_0(%arg0: i32, %arg1: i32, %arg2: i32, %arg3: i32) -> (i32, i32, i32) {
    %c0_i32 = arith.constant 0 : i32
    return %arg0, %arg1, %arg3 : i32, i32, i32
  }
  func.func @transform_1(%arg0: i32, %arg1: i32, %arg2: i32, %arg3: i32) -> (i32, i32, i32) {
    %c0_i32 = arith.constant 0 : i32
    return %arg0, %arg3, %arg2 : i32, i32, i32
  }
  func.func @transform_2(%arg0: i32, %arg1: i32, %arg2: i32, %arg3: i32) -> (i32, i32, i32) {
    %c0_i32 = arith.constant 0 : i32
    return %arg0, %arg1, %arg2 : i32, i32, i32
  }
}

</mosaic_0001>

<bundles_post_ra>
// kernel: tpu_custom_call.1
= control target key start
LH: loop header
LB: loop body
LE: loop exit
PB: predicated region body
PF: predicated region fallthrough
CT: control target
= control target key end

     0   :  { %7 = vsyncpa [#allocation4], 0  ;;  %s267_s0 = inlined_call_operand.hbm [shape: f32[2,8,32], index: 0, kind: input, shape index: {}]   ;;  %s268_s1 = inlined_call_operand.hbm [shape: f32[2,32,128], index: 1, kind: input, shape index: {}]   ;;  %s269_s2 = inlined_call_operand.hbm [shape: f32[2,8,128], index: 2, kind: output, shape index: {}]  }
   0x1   :  { %8 = vsyncpa [#allocation7], 0 }
   0x2   :  { %9 = vsyncpa [#allocation5], 0  ;;  %s14_s11 = sshll.u32 %s267_s0, 4  ;;  %s229_s12 = smov [#allocation3]   ;;  %s15_s11 = int_to_ptr.hbm [resolvable:$true] %s14_s11 }
   0x3   :  { %s16_s13 = sshll.u32 %s229_s12, 4  ;;  %s27_s16 = sshll.u32 %s268_s1, 4  ;;  %s17_s13 = int_to_ptr.vmem [resolvable:$true] %s16_s13  ;;  %s28_s16 = int_to_ptr.hbm [resolvable:$true] %s27_s16 }
   0x4   :  { %s230_s17 = smov 128   ;;  %s231_s18 = smov 8  }
   0x5   :  { %22 = dma.hbm_to_vmem [thread:$0]  %s15_s11, 256, %s17_s13, [#allocation4], %s230_s17, %s230_s17, %s231_s18  }
   0x6   :  { %s232_s19 = smov [#allocation6]  }
   0x7   :  { %s29_s20 = sshll.u32 %s232_s19, 4  ;;  %s30_s20 = int_to_ptr.vmem [resolvable:$true] %s29_s20 }
   0x8   :  { %35 = dma.hbm_to_vmem [thread:$0]  %s28_s16, 1024, %s30_s20, [#allocation7], %s230_s17, %s230_s17, %s231_s18  }
   0x9   :  { %223 = dma.done.wait [#allocation4], 256  }
   0xa   :  { %224 = vsyncadd [#allocation4], 4294967040 }
   0xb   :  { %225 = dma.done.wait [#allocation7], 1024  }
   0xc   :  { %226 = vsyncadd [#allocation7], 4294966272  ;;  %v49_v0 = vld [vmem:[#allocation6 + $0x18] sm:$0xff]  ;;  %v48_v2 = vld [vmem:[#allocation6 + $0x10] sm:$0xff]  ;;  %vm54_vm0 = vcmask 261120   ;;  %s233_s0 = smov [#allocation8]  }
   0xd   :  { %v53_v1 = vld [vmem:[#allocation6 + $0x38] sm:$0xff]  ;;  %70 = vmatpush.msra.mxu0 %v49_v0  ;;  %v52_v3 = vld [vmem:[#allocation6 + $0x30] sm:$0xff]  ;;  %v47_v4 = vld [vmem:[#allocation6 + $0x8] sm:$0xff]  ;;  %s128_s1 = sshll.u32 %s233_s0, 4  ;;  %s130_s23 = sshll.u32 %s269_s2, 4  ;;  %s129_s1 = int_to_ptr.vmem [resolvable:$true] %s128_s1  ;;  %s131_s23 = int_to_ptr.hbm [resolvable:$true] %s130_s23 }
   0xe   :  { %93 = vmatpush.msra.mxu1 %v53_v1  ;;  %v51_v5 = vld [vmem:[#allocation6 + $0x28] sm:$0xff]  ;;  %v46_v6 = vld [vmem:[#allocation6] sm:$0xff]  ;;  %v44_v8 = vld [vmem:[#allocation3] sm:$0xff] }
   0xf   :  { %71 = vmatpush.msra.mxu0 %v48_v2  ;;  %v50_v7 = vld [vmem:[#allocation6 + $0x20] sm:$0xff]  ;;  %v45_v9 = vld [vmem:[#allocation3 + $0x8] sm:$0xff] }
  0x10   :  { %94 = vmatpush.msra.mxu1 %v52_v3 }
  0x11   :  { %72 = vmatpush.msra.mxu0 %v47_v4 }
  0x12   :  { %95 = vmatpush.msra.mxu1 %v51_v5 }
  0x13   :  { %73 = vmatpush.msra.mxu0 %v46_v6 }
  0x14   :  { %96 = vmatpush.msra.mxu1 %v50_v7  ;;  %144 = vmatmul.msk.f32.vlgmr.msra.gmra.mxu0 %vm54_vm0, %v44_v8 }
  0x15   :  { %145 = vmatmul.msk.f32.vlgmr.msra.gmra.mxu1 %vm54_vm0, %v45_v9 }
  0x91   :  { %v75_v10 = vpop.f32.mrf.mxu0 }
  0x92   :  { %v98_v11 = vpop.f32.mrf.mxu1  ;;  %122 = vst [vmem:[#allocation8] sm:$0xff] %v75_v10 }
  0x93   :  { %123 = vst [vmem:[#allocation8 + $0x8] sm:$0xff] %v98_v11 }
  0x94   :  { %136 = dma.vmem_to_hbm [thread:$0]  %s129_s1, 256, %s131_s23, [#allocation5], %s230_s17, %s230_s17, %s231_s18  }
  0x95   :  { %227 = dma.done.wait [#allocation5], 256  }
  0x96   :  { %228 = vsyncadd [#allocation5], 4294967040 }
  0x97   :  { %141 = vsyncpa [#allocation4], 1 }
  0x98   :  { %142 = vsyncpa [#allocation7], 1 }
  0x99   :  { %143 = vsyncpa [#allocation5], 1 }

</bundles_post_ra>
